<compile_context>
chip_gen: v7x
topology: tpu7x:2x2x1
jax: 0.10.0
libtpu: 0.0.40
codegen_flags: <defaults>
</compile_context>

<pallas_src>
import jax
import jax.numpy as jnp
import numpy as np
from jax.experimental import pallas as pl
from jax.experimental.pallas import tpu as pltpu

KS = 3          # kernel size
PAD = 1         # padding
STRIDE = 1      # stride


def conv_bn_relu_kernel(p_ref, w_ref, scale_ref, bias_ref, o_ref):
    # p_ref:     (1, K, TM)    bf16  im2col patches: K = KS*KS*Cin on sublanes, TM spatial on lanes
    # w_ref:     (Cout, K)     bf16  im2col weight matrix
    # scale_ref: (Cout, 1)     f32   folded BN scale = gamma / sqrt(var+eps)
    # bias_ref:  (Cout, 1)     f32   folded BN bias  = beta - mean*scale
    # o_ref:     (1, Cout, TM) f32   channel-packed output tile (NCHW-flat)
    acc = jnp.dot(w_ref[...], p_ref[0],
                  preferred_element_type=jnp.float32)            # (Cout, TM) f32
    out = jnp.maximum(acc * scale_ref[...] + bias_ref[...], 0.0)  # folded BN + ReLU
    o_ref[0] = out.astype(o_ref.dtype)


def _choose_tm(total_m, target=512):
    """Largest multiple-of-128 divisor of total_m that is <= target.
    Falls back to total_m itself (full-dim block) if none exists."""
    best = None
    t = 128
    while t <= min(target, total_m):
        if total_m % t == 0:
            best = t
        t += 128
    return best if best is not None else total_m


def conv_bn_relu(x_nchw, weight_oihw, gamma, beta, run_mean, run_var, eps=1e-5):
    """Forward pass matching ConvBNReLU (eval-mode BN). x_nchw: (N, Cin, H, W)."""
    N, Cin, H, W = x_nchw.shape
    Cout = weight_oihw.shape[0]
    K = KS * KS * Cin
    HW = H * W

    # Fold BN into per-channel affine (column vectors: broadcast along lanes in-kernel).
    scale = (gamma / jnp.sqrt(run_var + eps)).astype(jnp.float32).reshape(Cout, 1)
    bias = (beta.astype(jnp.float32).reshape(Cout, 1)
            - run_mean.astype(jnp.float32).reshape(Cout, 1) * scale)

    # Wrapper-side im2col (Cin is tiny, so the 9x duplication is cheap); ordering is
    # (kh, kw, c), matching the HWIO weight reshape below.
    x_nhwc = jnp.transpose(x_nchw, (0, 2, 3, 1)).astype(jnp.bfloat16)
    x_pad = jnp.pad(x_nhwc, ((0, 0), (PAD, PAD), (PAD, PAD), (0, 0)))
    cols = []
    for kh in range(KS):
        for kw in range(KS):
            cols.append(x_pad[:, kh:kh + H, kw:kw + W, :])        # (N, H, W, Cin)
    patches = jnp.concatenate(cols, axis=-1)                      # (N, H, W, K)
    patches = patches.reshape(N, HW, K)
    patches = jnp.transpose(patches, (0, 2, 1))                   # (N, K, HW): spatial on lanes

    # OIHW -> HWIO -> (K, Cout) -> (Cout, K), bf16.
    w_hwio = jnp.transpose(weight_oihw, (2, 3, 1, 0)).astype(jnp.bfloat16)
    w2d = jnp.transpose(w_hwio.reshape(K, Cout), (1, 0))          # (Cout, K)

    TM = _choose_tm(HW)
    assert HW % TM == 0
    nm = HW // TM

    cost = pl.CostEstimate(
        flops=2 * N * HW * K * Cout,
        transcendentals=0,
        bytes_accessed=(patches.size * 2 + w2d.size * 2
                        + 2 * Cout * 4 + N * Cout * HW * 4))

    out_flat = pl.pallas_call(
        conv_bn_relu_kernel,
        out_shape=jax.ShapeDtypeStruct((N, Cout, HW), jnp.float32),
        grid_spec=pltpu.PrefetchScalarGridSpec(
            num_scalar_prefetch=0,
            grid=(N, nm),
            in_specs=[
                pl.BlockSpec((1, K, TM), lambda n, m: (n, 0, m)),
                pl.BlockSpec((Cout, K), lambda n, m: (0, 0)),
                pl.BlockSpec((Cout, 1), lambda n, m: (0, 0)),
                pl.BlockSpec((Cout, 1), lambda n, m: (0, 0)),
            ],
            out_specs=pl.BlockSpec((1, Cout, TM), lambda n, m: (n, 0, m)),
        ),
        compiler_params=pltpu.CompilerParams(
            dimension_semantics=("parallel", "parallel")),
        cost_estimate=cost,
    )(patches, w2d, scale, bias)

    # Channel-packed output is already NCHW with flattened spatial dims: free reshape.
    return out_flat.reshape(N, Cout, H, W)


def reference(x_nchw, weight_oihw, gamma, beta, run_mean, run_var, eps=1e-5):
    """Pure-JAX reference (lax conv, eval-mode BN). Inputs rounded through bf16 to
    match the kernel's MXU input precision (accumulation is f32 in both)."""
    x = x_nchw.astype(jnp.bfloat16).astype(jnp.float32)
    w = weight_oihw.astype(jnp.bfloat16).astype(jnp.float32)
    feat = jax.lax.conv_general_dilated(
        x, w,
        window_strides=(STRIDE, STRIDE), padding=((PAD, PAD), (PAD, PAD)),
        dimension_numbers=("NCHW", "OIHW", "NCHW"))
    scale = (gamma / jnp.sqrt(run_var + eps)).reshape(1, -1, 1, 1)
    bias = (beta - run_mean * gamma / jnp.sqrt(run_var + eps)).reshape(1, -1, 1, 1)
    return jnp.maximum(feat * scale + bias, 0.0)


if __name__ == "__main__":
    # Small shapes consistent with the module: in_chan=4, out_chan=8, 16x16 spatial.
    N, Cin, Cout, H, W = 2, 4, 8, 16, 16

    key = jax.random.PRNGKey(0)
    kx, kw, kg, kb, km, kv = jax.random.split(key, 6)

    x = jax.random.normal(kx, (N, Cin, H, W), jnp.float32)
    # Conv2d weight (no bias): (out_chan, in_chan, ks, ks)
    weight = jax.random.normal(kw, (Cout, Cin, KS, KS), jnp.float32) * 0.1
    # BatchNorm2d parameters / running stats (deterministic, non-trivial).
    gamma = 1.0 + 0.1 * jax.random.normal(kg, (Cout,), jnp.float32)
    beta = 0.1 * jax.random.normal(kb, (Cout,), jnp.float32)
    run_mean = 0.1 * jax.random.normal(km, (Cout,), jnp.float32)
    run_var = jnp.abs(jax.random.normal(kv, (Cout,), jnp.float32)) + 0.5

    out = conv_bn_relu(x, weight, gamma, beta, run_mean, run_var)
    out = jax.block_until_ready(out)

    ref = jax.block_until_ready(reference(x, weight, gamma, beta, run_mean, run_var))
    np.testing.assert_allclose(np.asarray(out), np.asarray(ref), atol=2e-3, rtol=2e-3)

    print("KERNEL_OK")
</pallas_src>

<mosaic_0001>
module attributes {stable_mosaic.version = 11 : i64} {
  func.func @conv_bn_relu_kernel(%arg0: i32, %arg1: i32, %arg2: memref<1x36x256xbf16, #tpu.memory_space<vmem>>, %arg3: memref<8x36xbf16, #tpu.memory_space<vmem>>, %arg4: memref<8x1xf32, #tpu.memory_space<vmem>>, %arg5: memref<8x1xf32, #tpu.memory_space<vmem>>, %arg6: memref<1x8x256xf32, #tpu.memory_space<vmem>>) attributes {dimension_semantics = [#tpu.dimension_semantics<parallel>, #tpu.dimension_semantics<parallel>], iteration_bounds = array<i64: 2, 1>, scalar_prefetch = 0 : i64, scratch_operands = 0 : i64, tpu.core_type = #tpu.core_type<tc>, window_params = [{transform_indices = @transform_0, window_bounds = array<i64: 1, 36, 256>}, {pipeline_mode = #tpu.pipeline_mode<synchronous>, transform_indices = @transform_1, window_bounds = array<i64: 8, 36>}, {pipeline_mode = #tpu.pipeline_mode<synchronous>, transform_indices = @transform_2, window_bounds = array<i64: 8, 1>}, {pipeline_mode = #tpu.pipeline_mode<synchronous>, transform_indices = @transform_3, window_bounds = array<i64: 8, 1>}, {transform_indices = @transform_4, window_bounds = array<i64: 1, 8, 256>}]} {
    %c0 = arith.constant 0 : index
    %c0_0 = arith.constant 0 : index
    %0 = vector.load %arg3[%c0, %c0_0] : memref<8x36xbf16, #tpu.memory_space<vmem>>, vector<8x36xbf16>
    %c0_1 = arith.constant 0 : index
    %c0_2 = arith.constant 0 : index
    %c0_3 = arith.constant 0 : index
    %1 = vector.load %arg2[%c0_1, %c0_2, %c0_3] : memref<1x36x256xbf16, #tpu.memory_space<vmem>>, vector<1x36x256xbf16>
    %2 = vector.shape_cast %1 : vector<1x36x256xbf16> to vector<36x256xbf16>
    %cst = arith.constant dense<0.000000e+00> : vector<8x256xf32>
    %3 = tpu.matmul %0, %2, %cst {dimension_numbers = #tpu.dot_dimension_numbers<[1], [0], [0], [1], [0, 0, 1, 1], [], []>} : vector<8x36xbf16>, vector<36x256xbf16>, vector<8x256xf32> -> vector<8x256xf32>
    %c0_4 = arith.constant 0 : index
    %c0_5 = arith.constant 0 : index
    %4 = vector.load %arg4[%c0_4, %c0_5] : memref<8x1xf32, #tpu.memory_space<vmem>>, vector<8x1xf32>
    %5 = vector.broadcast %4 : vector<8x1xf32> to vector<8x256xf32>
    %6 = arith.mulf %3, %5 : vector<8x256xf32>
    %c0_6 = arith.constant 0 : index
    %c0_7 = arith.constant 0 : index
    %7 = vector.load %arg5[%c0_6, %c0_7] : memref<8x1xf32, #tpu.memory_space<vmem>>, vector<8x1xf32>
    %8 = vector.broadcast %7 : vector<8x1xf32> to vector<8x256xf32>
    %9 = arith.addf %6, %8 : vector<8x256xf32>
    %cst_8 = arith.constant 0.000000e+00 : f32
    %10 = vector.broadcast %cst_8 : f32 to vector<8x256xf32>
    %11 = arith.maximumf %9, %10 : vector<8x256xf32>
    %c0_9 = arith.constant 0 : index
    %c0_10 = arith.constant 0 : index
    %c0_11 = arith.constant 0 : index
    %12 = vector.load %arg6[%c0_9, %c0_10, %c0_11] : memref<1x8x256xf32, #tpu.memory_space<vmem>>, vector<1x8x256xf32>
    %13 = vector.shape_cast %12 : vector<1x8x256xf32> to vector<8x256xf32>
    %14 = vector.shape_cast %11 : vector<8x256xf32> to vector<1x8x256xf32>
    tpu.vector_store %arg6[%c0_9, %c0_10, %c0_11], %14 {strides = array<i32>} : memref<1x8x256xf32, #tpu.memory_space<vmem>>, vector<1x8x256xf32>,
    return
  }
  func.func @transform_0(%arg0: i32, %arg1: i32) -> (i32, i32, i32) {
    %c0_i32 = arith.constant 0 : i32
    %c0_i32_0 = arith.constant 0 : i32
    return %arg0, %c0_i32, %arg1 : i32, i32, i32
  }
  func.func @transform_1(%arg0: i32, %arg1: i32) -> (i32, i32) {
    %c0_i32 = arith.constant 0 : i32
    %c0_i32_0 = arith.constant 0 : i32
    %c0_i32_1 = arith.constant 0 : i32
    return %c0_i32, %c0_i32_0 : i32, i32
  }
  func.func @transform_2(%arg0: i32, %arg1: i32) -> (i32, i32) {
    %c0_i32 = arith.constant 0 : i32
    %c0_i32_0 = arith.constant 0 : i32
    %c0_i32_1 = arith.constant 0 : i32
    return %c0_i32, %c0_i32_0 : i32, i32
  }
  func.func @transform_3(%arg0: i32, %arg1: i32) -> (i32, i32) {
    %c0_i32 = arith.constant 0 : i32
    %c0_i32_0 = arith.constant 0 : i32
    %c0_i32_1 = arith.constant 0 : i32
    return %c0_i32, %c0_i32_0 : i32, i32
  }
  func.func @transform_4(%arg0: i32, %arg1: i32) -> (i32, i32, i32) {
    %c0_i32 = arith.constant 0 : i32
    %c0_i32_0 = arith.constant 0 : i32
    return %arg0, %c0_i32, %arg1 : i32, i32, i32
  }
}

</mosaic_0001>

<bundles_post_ra>
// kernel: tpu_custom_call.1
= control target key start
LH: loop header
LB: loop body
LE: loop exit
PB: predicated region body
PF: predicated region fallthrough
CT: control target
= control target key end

     0   :  { %9 = vsyncpa [#allocation3], 0  ;;  %s739_s0 = inlined_call_operand.vmem [shape: bf16[2,36,256], index: 0, kind: input, shape index: {}]   ;;  %s740_s1 = inlined_call_operand.vmem [shape: bf16[8,36], index: 1, kind: input, shape index: {}]   ;;  %s741_s2 = inlined_call_operand.vmem [shape: f32[8,1], index: 2, kind: input, shape index: {}]   ;;  %s742_s3 = inlined_call_operand.vmem [shape: f32[8,1], index: 3, kind: input, shape index: {}]   ;;  %s743_s4 = inlined_call_operand.hbm [shape: f32[2,8,256], index: 4, kind: output, shape index: {}]  }
   0x1   :  { %11 = vsyncpa [#allocation3 + $0x1], 0  ;;  %s618_s15 = smov 0   ;;  %s620_s16 = smov 0  }
   0x2   :  { %s622_s17 = smov 0   ;;  %s624_s18 = smov 0  }
   0x3   :  { %s626_s19 = smov 0   ;;  %s628_s20 = smov 0  }
   0x4 LB: > { %s424_s21 = sadd.s32 4294967295, %s589_s20   ;;  %s425_s22 = sadd.s32 4294967294, %s589_s20   ;;  %s589_s20 = sphi %s628_s20, %s17_s20   ;;  %s585_s19 = sphi %s626_s19, %s750_s19   ;;  %s581_s18 = sphi %s624_s18, %s749_s18   ;;  %s577_s17 = sphi %s622_s17, %s748_s17   ;;  %s573_s16 = sphi %s620_s16, %s747_s16   ;;  %s569_s15 = sphi %s618_s15, %s746_s15  }
   0x5   : > { %s29_s23 = sadd.s32 1, %s585_s19  ;;  %s129_s24 = sadd.s32 1, %s577_s17 }
   0x6   : > { %p31_p0 = scmp.ge.s32.totalorder %s29_s23, 2  ;;  %p139_p1 = scmp.ne.s32.totalorder %s577_s17, %s573_s16 }
   0x7   : > { %p140_p2 = scmp.eq.s32.totalorder %s424_s21, 1  ;;  %p145_p3 = scmp.ne.s32.totalorder %s573_s16, %s569_s15 }
   0x8   : > { %s752_s23 = smov (%p31_p0, %s29_s23), 0  ;;  %p146_p5 = scmp.eq.s32.totalorder %s425_s22, 1 }
   0x9   : > { %p658_p4 = por %p140_p2, %p139_p1  ;;  %s124_s26 = ssub.s32 %s585_s19, %s752_s23 }
   0xa   : > { %p428_p6 = scmp.ge.s32.totalorder %s589_s20, 1  ;;  %p127_p7 = scmp.eq.s32.totalorder %s124_s26, 0 }
   0xb   : > { %p665_p8 = por %p146_p5, %p145_p3  ;;  %p186_p9 = scmp.lt.s32.totalorder %s589_s20, 3 }
   0xc   : > { %s671_s28 = scalar_select %p127_p7, %s577_s17, %s129_s24  }
   0xd   : > { %p187_p10 = pnand %p428_p6, %p186_p9 }
   0xe   : > { %p217_p11 = scmp.lt.s32.totalorder (!%p187_p10), %s581_s18, 1  ;;  %v591_v0 = vmov (!%p187_p10), 0   ;;  %v311_v1 = vld [vmem:[%s741_s2] sm:$0xff] (!%p187_p10)  ;;  %vm263_vm0 = vcmask (!%p187_p10), 1041408   ;;  %vm259_vm1 = vcmask (!%p187_p10), 293888   ;;  %s213_s14 = sand.u32 (!%p187_p10), 1, %s573_s16  }
   0xf   : > { %190 = sbr.rel (%p187_p10) target bundleno = 273 (0x111), region = 36  ;;  %302 = vmatprep.mubr.bf16.mxu0 (!%p187_p10), %v591_v0  ;;  %502 = vset.pattern.permute.xlu0 (!%p187_p10), %v591_v0  ;;  %v319_v2 = vld [vmem:[%s742_s3] sm:$0xff] (!%p187_p10)  ;;  %s429_s21 = sshll.u32 (!%p187_p10), %s213_s14, 4 }
  0x10   : > { %314 = vperm.xlu0 (!%p187_p10), %502, %v311_v1   ;;  %v228_v11 = vld [vmem:[%s740_s1] sm:$0xf] (!%p187_p10)  ;;  %s444_s22 = sshll.u32 (!%p187_p10), %s581_s18, 8  ;;  %s215_s24 = scalar_lea.vmem (!%p187_p10), [#allocation2], %s429_s21 }
  0x11   : > { %s348_s26 = sshll.u32 (!%p187_p10), %s215_s24, 4  ;;  %s332_s6 = scalar_lea.sflag (!%p187_p10), [#allocation3], %s213_s14  ;;  %s694_s26 = int_to_ptr.vmem [resolvable:$true] %s348_s26 }
  0x12   : > { %s511_s7 = scalar_lea.vmem (!%p187_p10), %s694_s26, 256 }
  0x13   : > { %p512_p12 = scmp.ne.s32.totalorder (!%p187_p10), %s694_s26, %s511_s7 }
  0x14   : > { %322 = vperm.xlu0 (!%p187_p10), %502, %v319_v2  }
  0x15   : > { %p513_p13 = pnand (!%p187_p10), %p512_p12, %p658_p4 }
  0x16   : > { %s218_s5 = scalar_select %p217_p11, %s581_s18, 1 }
  0x17   : > { %p514_p0 = pneg %p513_p13  ;;  %s592_s18 = smov [#allocation2]  }
  0x18   : > { %s445_s8 = smul.u32 40, %s218_s5  ;;  %s692_s5 = scalar_lea.hbm %s743_s4, %s444_s22 }
  0x1a   : > { %s224_s11 = scalar_lea.vmem %s739_s0, %s445_s8  ;;  %s515_s8 = sshll.u32 %s592_s18, 4  ;;  %s516_s8 = int_to_ptr.vmem [resolvable:$false] %s515_s8 }
  0x1b   : > { %v503_v3 = vld [vmem:[%s224_s11 + $0x4] ss:$8 sps:$4 sm:$0xff]   ;;  %v505_v4 = vld [vmem:[%s224_s11] ss:$8 sps:$4 sm:$0xff]   ;;  %v506_v5 = vld [vmem:[%s224_s11 + $0x14] ss:$8 sps:$4 sm:$0xff]   ;;  %p518_p1 = scmp.lt.s32.totalorder %s694_s26, %s516_s8 }
  0x1c   : > { %270 = vmatprep.subr.bf16.mxu0 %v503_v3  ;;  %v233_v6 = vld [vmem:[%s224_s11 + $0x20] sm:$0x33]  ;;  %v508_v7 = vld [vmem:[%s224_s11 + $0x10] ss:$8 sps:$4 sm:$0xff]   ;;  %s517_s9 = scalar_lea.vmem %s516_s8, 512 }
  0x1d   : > { %271 = vmatpush1.bf16.msra.mxu0 %v505_v4  ;;  %v436_v8 = vcombine.high %v233_v6, %v233_v6  ;;  %v435_v9 = vcombine.low %v233_v6, %v233_v6  ;;  %p519_p2 = scmp.lt.s32.totalorder %s517_s9, %s511_s7 }
  0x1e   : > { %272 = vmatprep.subr.bf16.mxu0 %v506_v5 }
  0x1f   : > { %v265_v10 = vsel %vm263_vm0, %v435_v9, 0  ;;  %p520_p3 = por %p519_p2, %p518_p1 }
  0x21   : > { %273 = vmatpush1.bf16.msra.mxu0 %v508_v7  ;;  %p521_p5 = pnand %p520_p3, %p514_p0 }
  0x22   : > { %437 = vmatprep.subr.msk.bf16.mxu0 %vm263_vm0, %v436_v8 }
  0x25   : > { %275 = vmatpush1.bf16.msra.mxu0 %v265_v10 }
  0x28   : > { %438 = vmatmul.mubr.msk.bf16.vlgmr.msra.gmra.mrb[0].mxu0 %vm259_vm1, %v228_v11 }
  0x8f   : > { %v315_v12 = vpop.permute.xlu0 %314 }
  0x93   : > { %v323_v16 = vpop.permute.xlu0 %322 }
  0xfb   : > { %v304_v13 = vpop.f32.mrb[0].mxu0 }
  0xfc   : > { %v317_v14 = vmul.f32 %v315_v12, %v304_v13  ;;  %v306_v15 = vpop.f32.mrb[1].mxu0 }
  0xfd   : > { %v318_v17 = vmul.f32 %v315_v12, %v306_v15  ;;  %v308_v18 = vpop.f32.mrb[2].mxu0 }
  0xfe   : > { %v325_v19 = vadd.f32 %v323_v16, %v317_v14  ;;  %v309_v20 = vpop.f32.mrb[3].mxu0 }
  0xff   : > { %v326_v21 = vadd.f32 %v323_v16, %v318_v17 }
 0x100   : > { %v327_v22 = vmax.f32 %v325_v19, 0.0 }
 0x101   : > { %v328_v23 = vmax.f32 %v326_v21, 0.0 }
 0x102   : > { %329 = vst [vmem:[%s215_s24] sm:$0xff] %v327_v22 }
 0x103   : > { %330 = vst [vmem:[%s215_s24 + $0x8] sm:$0xff] %v328_v23 }
 0x104   : > { %524 = shalt.err (!%p521_p5)
}
 0x105   : > { %s525_s10 = scalar_lea.hbm %s692_s5, 256  ;;  %s529_s13 = scalar_lea.hbm %s743_s4, 512 }
 0x106   : > { %p526_p6 = scmp.ne.s32.totalorder %s692_s5, %s525_s10  ;;  %p530_p10 = scmp.lt.u32.totalorder %s692_s5, %s743_s4 }
 0x107   : > { %p531_p11 = scmp.lt.u32.totalorder %s529_s13, %s525_s10  ;;  %p533_p13 = scmp.lt.u32.totalorder %s525_s10, %s692_s5 }
 0x108   : > { %p527_p7 = pnand %p526_p6, %p658_p4 }
 0x109   : > { %p532_p12 = por %p531_p11, %p530_p10 }
 0x10a   : > { %p528_p9 = pneg %p527_p7 }
 0x10b   : > { %p534_p0 = por %p533_p13, %p532_p12 }
 0x10d   : > { %p535_p1 = pnand %p534_p0, %p528_p9 }
 0x10f   : > { %538 = shalt.err (!%p535_p1)
}
 0x110   : > { %446 = dma.vmem_to_hbm [thread:$0]  (%p658_p4), %s694_s26, 256, %s692_s5, %s332_s6  }
 0x111 PF: > { %p452_p2 = scmp.ge.s32.totalorder %s589_s20, 2  ;;  %s360_s22 = sand.u32 1, %s569_s15  }
 0x112   : > { %s361_s24 = scalar_lea.sflag [#allocation3], %s360_s22 }
 0x113   : > { %p449_p3 = pnand %p452_p2, %p665_p8 }
 0x115   : > { %564 = dma.done.wait (!%p449_p3), %s361_s24, 256  }
 0x116   : > { %566 = vsyncadd (!%p449_p3), %s361_s24, 4294967040  ;;  %s17_s20 = sadd.s32 1, %s589_s20   ;;  %s746_s15 = smov %s573_s16 }
 0x117   : > { %p14_p5 = scmp.ge.s32.totalorder %s17_s20, 4   ;;  %s747_s16 = smov %s577_s17 }
 0x118   : > { %s748_s17 = smov %s671_s28  ;;  %s749_s18 = smov %s585_s19 }
 0x119   : > { %s750_s19 = smov %s752_s23  ;;  %16 = sbr.rel (!%p14_p5) target bundleno = 4 (0x4), region = 71 }
 0x120   :  { %366 = vsyncpa [#allocation3], 1 }
 0x121   :  { %368 = vsyncpa [#allocation3 + $0x1], 1 }

</bundles_post_ra>
